<compile_context>
chip_gen: v7x
topology: tpu7x:2x2x1
jax: 0.10.0
libtpu: 0.0.40
codegen_flags: <defaults>
</compile_context>

<pallas_src>
import functools

import numpy as np
import jax
import jax.numpy as jnp
from jax.experimental import pallas as pl
from jax.experimental.pallas import tpu as pltpu


def _round_up(x, m):
    return (x + m - 1) // m * m


# ---------------------------------------------------------------------------
# Generic tiled matmul (bf16 x bf16, f32 accumulation), optional bias + act.
# ---------------------------------------------------------------------------
def _mm_kernel(x_ref, w_ref, o_ref):
    o_ref[...] = jnp.dot(x_ref[...], w_ref[...],
                         preferred_element_type=jnp.float32).astype(o_ref.dtype)


def _mm_bias_act_kernel(x_ref, w_ref, b_ref, o_ref, *, act):
    r = jnp.dot(x_ref[...], w_ref[...], preferred_element_type=jnp.float32)
    r = r + b_ref[...]
    if act == "leaky_relu":
        r = jnp.where(r >= 0, r, 0.2 * r)
    elif act == "tanh":
        r = jnp.tanh(r)
    o_ref[...] = r.astype(o_ref.dtype)


def matmul_bf16(x, w, bias=None, act=None, out_dtype=jnp.bfloat16):
    """x: (M, K), w: (K, N) -> (M, N) in out_dtype (default bf16)."""
    m, k = x.shape
    n = w.shape[1]
    mp = _round_up(m, 8)
    if mp != m:
        x = jnp.pad(x, ((0, mp - m), (0, 0)))
    x = x.astype(jnp.bfloat16)
    w = w.astype(jnp.bfloat16)

    if n <= 256:
        bn = n
    else:
        bn = 2048
        while bn > 128 and (bn * k * 2 > (4 << 20) or n % bn):
            bn //= 2
        if n % bn:
            bn = n
    bm = min(mp, 4096)
    while bm > 8 and (bm * bn * 2 > (6 << 20) or mp % bm):
        bm //= 2
    bm = max(bm, 8)
    grid = (mp // bm, n // bn)
    cp = pltpu.CompilerParams(dimension_semantics=("parallel", "parallel"),
                              vmem_limit_bytes=36 * 1024 * 1024)

    if bias is None:
        out = pl.pallas_call(
            _mm_kernel,
            out_shape=jax.ShapeDtypeStruct((mp, n), out_dtype),
            grid=grid,
            in_specs=[pl.BlockSpec((bm, k), lambda i, j: (i, 0)),
                      pl.BlockSpec((k, bn), lambda i, j: (0, j))],
            out_specs=pl.BlockSpec((bm, bn), lambda i, j: (i, j)),
            compiler_params=cp,
        )(x, w)
    else:
        b2 = bias.reshape(1, n).astype(jnp.float32)
        out = pl.pallas_call(
            functools.partial(_mm_bias_act_kernel, act=act),
            out_shape=jax.ShapeDtypeStruct((mp, n), out_dtype),
            grid=grid,
            in_specs=[pl.BlockSpec((bm, k), lambda i, j: (i, 0)),
                      pl.BlockSpec((k, bn), lambda i, j: (0, j)),
                      pl.BlockSpec((1, bn), lambda i, j: (0, j))],
            out_specs=pl.BlockSpec((bm, bn), lambda i, j: (i, j)),
            compiler_params=cp,
        )(x, w, b2)
    return out[:m]


# ---------------------------------------------------------------------------
# Conv3d(kernel=4, stride=2, padding=1), channels-last, phase-packed input.
# ---------------------------------------------------------------------------
def _pack_conv_input(x, hwp_pad):
    """(D,H,W,C) -> phase-packed (D/2+1, hwp_pad, 8*C) bf16."""
    d, h, w, c = x.shape
    do, ho, wo = d // 2, h // 2, w // 2
    xp = jnp.pad(x, ((1, 1), (1, 1), (1, 1), (0, 0)))
    q = xp.reshape(do + 1, 2, ho + 1, 2, wo + 1, 2, c)
    q = q.transpose(0, 2, 4, 1, 3, 5, 6)               # (a, hq, wq, rd, rh, rw, c)
    q = q.reshape(do + 1, (ho + 1) * (wo + 1), 8 * c)
    q = jnp.pad(q, ((0, 0), (0, hwp_pad - (ho + 1) * (wo + 1)), (0, 0)))
    return q.astype(jnp.bfloat16)


def pack_conv_weight(w):
    """PyTorch Conv3d weight (Co,Ci,4,4,4) -> (8 shift taps, 8*Ci, Co) bf16."""
    co, ci = w.shape[:2]
    w8 = w.reshape(co, ci, 2, 2, 2, 2, 2, 2)            # (co, ci, ad, rd, ah, rh, aw, rw)
    w8 = jnp.transpose(w8, (4, 6, 2, 3, 5, 7, 1, 0))    # (ah, aw, ad, rd, rh, rw, ci, co)
    return w8.reshape(8, 8 * ci, co).astype(jnp.bfloat16)


def pack_conv1_weight(w):
    """PyTorch Conv3d weight (Co,1,4,4,4) -> im2col matrix (64, Co) bf16."""
    co, ci = w.shape[:2]
    return jnp.transpose(w, (2, 3, 4, 1, 0)).reshape(64 * ci, co).astype(jnp.bfloat16)


def _convA_kernel(pa_ref, pb_ref, w_ref, b_ref, o_ref, *, P, mrow, rowstride, fuse):
    # P output depth planes per step, all 8 shift taps unrolled, weight resident.
    for p in range(P):
        acc = None
        for j in range(8):
            ad = j % 2
            hw = j // 2
            roff = (hw // 2) * rowstride + (hw % 2)
            sp = p + ad
            if sp < P:
                xs = pa_ref[sp, pl.ds(roff, mrow), :]
            else:
                xs = pb_ref[0, pl.ds(roff, mrow), :]
            t = jnp.dot(xs, w_ref[j], preferred_element_type=jnp.float32)
            acc = t if acc is None else acc + t
        if fuse:
            acc = acc + b_ref[...]
            acc = jnp.where(acc >= 0, acc, 0.2 * acc)
        o_ref[p] = acc.astype(o_ref.dtype)


def _convB_kernel(q_ref, w_ref, b_ref, o_ref, acc_ref, *, cw, do, mrow, rowstride,
                  nwc, fuse):
    # whole packed activation resident; grid over (co-half, weight tap chunk).
    wc = pl.program_id(1)

    @pl.when(wc == 0)
    def _():
        acc_ref[...] = jnp.zeros_like(acc_ref)

    for jj in range(cw):
        tap = wc * cw + jj
        ad = tap % 2
        hw = tap // 2
        roff = (hw // 2) * rowstride + (hw % 2)
        for qi in range(do):
            xs = q_ref[qi + ad, pl.ds(roff, mrow), :]
            acc_ref[qi] += jnp.dot(xs, w_ref[jj], preferred_element_type=jnp.float32)

    @pl.when(wc == nwc - 1)
    def _():
        r = acc_ref[...]
        if fuse:
            r = r + b_ref[0][None, None, :]
            r = jnp.where(r >= 0, r, 0.2 * r)
        o_ref[...] = r.astype(o_ref.dtype)


def conv3d_s2(x, w_packed, bias, *, fuse_act=False, force_mode=None,
              chunk_cap=(4 << 20)):
    """x: (D,H,W,Ci); w_packed: (8, 8*Ci, Co). Returns (D/2,H/2,W/2,Co) bf16."""
    d, h, wd, ci = x.shape
    k = 8 * ci
    co = w_packed.shape[-1]
    do, ho, wo = d // 2, h // 2, wd // 2
    hwp = (ho + 1) * (wo + 1)
    mrow = ho * (wo + 1)
    rowstride = wo + 1
    hwp_pad = _round_up(hwp + wo + 3, 8)
    q = _pack_conv_input(x, hwp_pad)
    bias2 = bias.reshape(1, co).astype(jnp.float32)

    wbytes = int(np.prod(w_packed.shape)) * 2
    mode = force_mode or ("B" if wbytes > (6 << 20) else "A")

    if mode == "A":
        P = min(do, 4)
        while do % P:
            P -= 1
        kern = functools.partial(_convA_kernel, P=P, mrow=mrow,
                                 rowstride=rowstride, fuse=fuse_act)
        out = pl.pallas_call(
            kern,
            out_shape=jax.ShapeDtypeStruct((do, mrow, co), jnp.bfloat16),
            grid=(do // P,),
            in_specs=[pl.BlockSpec((P, hwp_pad, k), lambda i: (i, 0, 0)),
                      pl.BlockSpec((1, hwp_pad, k), lambda i: (i * P + P, 0, 0)),
                      pl.BlockSpec((8, k, co), lambda i: (0, 0, 0)),
                      pl.BlockSpec((1, co), lambda i: (0, 0))],
            out_specs=pl.BlockSpec((P, mrow, co), lambda i: (i, 0, 0)),
            compiler_params=pltpu.CompilerParams(
                dimension_semantics=("parallel",),
                vmem_limit_bytes=36 * 1024 * 1024),
        )(q, q, w_packed, bias2)
    else:
        assert co % 2 == 0 and (co // 2) % 128 == 0
        cohalf = co // 2
        cw = 8
        while cw > 1 and cw * k * cohalf * 2 > chunk_cap:
            cw //= 2
        nwc = 8 // cw
        kern = functools.partial(_convB_kernel, cw=cw, do=do, mrow=mrow,
                                 rowstride=rowstride, nwc=nwc, fuse=fuse_act)
        out = pl.pallas_call(
            kern,
            out_shape=jax.ShapeDtypeStruct((do, mrow, co), jnp.bfloat16),
            grid=(2, nwc),
            in_specs=[pl.BlockSpec((do + 1, hwp_pad, k), lambda j, wc: (0, 0, 0)),
                      pl.BlockSpec((cw, k, cohalf), lambda j, wc: (wc, 0, j)),
                      pl.BlockSpec((1, cohalf), lambda j, wc: (0, j))],
            out_specs=pl.BlockSpec((do, mrow, cohalf), lambda j, wc: (0, 0, j)),
            scratch_shapes=[pltpu.VMEM((do, mrow, cohalf), jnp.float32)],
            compiler_params=pltpu.CompilerParams(
                dimension_semantics=("parallel", "arbitrary"),
                vmem_limit_bytes=36 * 1024 * 1024),
        )(q, w_packed, bias2)

    return out.reshape(do, ho, wo + 1, co)[:, :, :wo, :]


def encode_block1(x, p):
    """Conv3d(1->filt, 4,2,1) + bias + LeakyReLU(0.2) via im2col matmul (Ci=1)."""
    d, h, wd, ci = x.shape
    assert ci == 1
    do, ho, wo = d // 2, h // 2, wd // 2
    xp = jnp.pad(x[..., 0].astype(jnp.bfloat16), ((1, 1), (1, 1), (1, 1)))
    cols = [xp[kd:kd + 2 * do:2, kh:kh + 2 * ho:2, kw:kw + 2 * wo:2]
            for kd in range(4) for kh in range(4) for kw in range(4)]
    xcol = jnp.stack(cols, axis=-1).reshape(do * ho * wo, 64)
    y = matmul_bf16(xcol, p["w"], bias=p["b"], act="leaky_relu")
    return y.reshape(do, ho, wo, -1)


# ---------------------------------------------------------------------------
# ConvTranspose3d(kernel=4, stride=2, padding=1) = col2im matmul + overlap-add.
# ---------------------------------------------------------------------------
def pack_convt_weight_col(w):
    """PyTorch ConvTranspose3d weight (Ci,Co,4,4,4) -> (Ci, 64*Co) bf16,
    columns ordered (kd, kh, kw, co)."""
    ci, co = w.shape[:2]
    return jnp.transpose(w, (0, 2, 3, 4, 1)).reshape(ci, 64 * co).astype(jnp.bfloat16)


def _fold_pair(a, sp_ax, a_ax):
    """Overlap-add one dim: spatial axis n and 2-valued 'a' axis -> n+1, 'a' removed."""
    a0 = jnp.take(a, 0, axis=a_ax)
    a1 = jnp.take(a, 1, axis=a_ax)
    pad0 = [(0, 0)] * a0.ndim
    pad0[sp_ax] = (0, 1)
    pad1 = [(0, 0)] * a0.ndim
    pad1[sp_ax] = (1, 0)
    return jnp.pad(a0, pad0) + jnp.pad(a1, pad1)


def convtranspose3d_s2(x, w_col):
    """x: (D,H,W,Ci); w_col: (Ci, 64*Co). Returns (2D,2H,2W,Co) bf16."""
    d, h, w_, ci = x.shape
    co = w_col.shape[1] // 64
    contrib = matmul_bf16(x.reshape(d * h * w_, ci), w_col)      # (M, 64*Co) bf16
    c = contrib.reshape(d, h, w_, 2, 2, 2, 2, 2, 2, co)          # (ad,bd,ah,bh,aw,bw)
    c = _fold_pair(c, 0, 3)                                      # depth
    c = _fold_pair(c, 1, 4)                                      # height
    c = _fold_pair(c, 2, 5)                                      # width
    # axes: (d+1, h+1, w+1, bd, bh, bw, co)
    y = jnp.transpose(c, (0, 3, 1, 4, 2, 5, 6)).reshape(
        2 * d + 2, 2 * h + 2, 2 * w_ + 2, co)
    return y[1:-1, 1:-1, 1:-1, :]


# ---------------------------------------------------------------------------
# Fused InstanceNorm3d(affine=False) + activation (no transposes, lane-folded).
# ---------------------------------------------------------------------------
def _stats_kernel(x_ref, o_ref):
    x = x_ref[...].astype(jnp.float32)
    part = jnp.concatenate(
        [jnp.sum(x, axis=0)[None, :], jnp.sum(x * x, axis=0)[None, :]], axis=0)

    @pl.when(pl.program_id(0) == 0)
    def _():
        o_ref[...] = jnp.zeros_like(o_ref)

    o_ref[...] += part


def _scale_act_kernel(x_ref, sc_ref, sh_ref, o_ref, *, act):
    x = x_ref[...].astype(jnp.float32) * sc_ref[...] + sh_ref[...]
    if act == "leaky_relu":
        x = jnp.where(x >= 0, x, 0.2 * x)
    elif act == "relu":
        x = jnp.maximum(x, 0.0)
    o_ref[...] = x.astype(o_ref.dtype)


def _pick_rows(r, lanes):
    target = max(8, (1 << 21) // (lanes * 4))
    tr = 1
    while tr * 2 <= min(r, target):
        tr *= 2
    while r % tr:
        tr //= 2
    return max(tr, 1)


def norm_act(y, *, act):
    """y: (D,H,W,C) bf16. InstanceNorm per channel over D*H*W, then activation."""
    spatial = y.shape[:-1]
    c = y.shape[-1]
    s = int(np.prod(spatial))
    if c >= 128:
        lanes, rep = c, 1
    else:
        assert 128 % c == 0
        lanes, rep = 128, 128 // c
    r = s * c // lanes
    y2 = y.reshape(r, lanes)
    tr = _pick_rows(r, lanes)

    sums = pl.pallas_call(
        _stats_kernel,
        out_shape=jax.ShapeDtypeStruct((2, lanes), jnp.float32),
        grid=(r // tr,),
        in_specs=[pl.BlockSpec((tr, lanes), lambda i: (i, 0))],
        out_specs=pl.BlockSpec((2, lanes), lambda i: (0, 0)),
        compiler_params=pltpu.CompilerParams(dimension_semantics=("arbitrary",)),
    )(y2)
    sums = sums.reshape(2, rep, c).sum(axis=1)
    mean = sums[0] / s
    var = jnp.maximum(sums[1] / s - mean * mean, 0.0)
    rstd = jax.lax.rsqrt(var + 1e-5)
    scale = jnp.tile(rstd, rep).reshape(1, lanes)
    shift = jnp.tile(-mean * rstd, rep).reshape(1, lanes)  # conv bias cancels here

    out = pl.pallas_call(
        functools.partial(_scale_act_kernel, act=act),
        out_shape=jax.ShapeDtypeStruct((r, lanes), jnp.bfloat16),
        grid=(r // tr,),
        in_specs=[pl.BlockSpec((tr, lanes), lambda i: (i, 0)),
                  pl.BlockSpec((1, lanes), lambda i: (0, 0)),
                  pl.BlockSpec((1, lanes), lambda i: (0, 0))],
        out_specs=pl.BlockSpec((tr, lanes), lambda i: (i, 0)),
        compiler_params=pltpu.CompilerParams(dimension_semantics=("parallel",)),
    )(y2, scale, shift)
    return out.reshape(spatial + (c,))


# ---------------------------------------------------------------------------
# Blocks (block.py not provided; standard pix2pix-3D forms assumed)
# ---------------------------------------------------------------------------
def encode_block(x, p, *, instance_norm=True):
    y = conv3d_s2(x, p["w"], p["b"], fuse_act=not instance_norm)
    if instance_norm:
        y = norm_act(y, act="leaky_relu")
    return y


def decode_block(x, skip, p):
    # Dropout3d is identity at inference time.
    y = convtranspose3d_s2(x, p["w"])
    y = norm_act(y, act="relu")
    return jnp.concatenate([y, skip], axis=-1)


def attention_block_dwn(x, prm):
    # TODO(synk): block.Attention_Block_dwn ('SSAM1') definition unavailable
    # (block.py not provided); shape-preserving squeeze-excite channel gate.
    w1, b1, w2, b2 = prm
    g = jnp.mean(x.astype(jnp.float32), axis=(0, 1, 2))
    z = jax.nn.relu(g @ w1 + b1)
    gate = jax.nn.sigmoid(z @ w2 + b2)
    return (x.astype(jnp.float32) * gate).astype(x.dtype)


def final_layer(x, p):
    y = convtranspose3d_s2(x, p["w"])
    return jnp.tanh(y.astype(jnp.float32) + p["b"].astype(jnp.float32))


# ---------------------------------------------------------------------------
# Parameters (deterministic synthetic init) and forward pass
# ---------------------------------------------------------------------------
def init_params(key, filt=32):
    keys = iter(jax.random.split(key, 64))

    def nrm(shape, std=0.02):
        return std * jax.random.normal(next(keys), shape, dtype=jnp.float32)

    def conv_p(ci, co):
        return {"w": nrm((co, ci, 4, 4, 4)), "b": jnp.zeros((co,), jnp.float32)}

    def convt_p(ci, co):
        return {"w": nrm((ci, co, 4, 4, 4)), "b": jnp.zeros((co,), jnp.float32)}

    def attn_p(c):
        rr = max(c // 8, 1)
        return (nrm((c, rr)), jnp.zeros((rr,), jnp.float32),
                nrm((rr, c)), jnp.zeros((c,), jnp.float32))

    return {
        "e1": conv_p(1, filt), "e2": conv_p(filt, filt * 2),
        "e3": conv_p(filt * 2, filt * 4), "e4": conv_p(filt * 4, filt * 8),
        "e5": conv_p(filt * 8, filt * 16), "e6": conv_p(filt * 16, filt * 16),
        "e7": conv_p(filt * 16, filt * 16),
        "att1": attn_p(filt * 4), "att2": attn_p(filt * 8),
        "d1": convt_p(filt * 16, filt * 16), "d2": convt_p(filt * 32, filt * 16),
        "d3": convt_p(filt * 32, filt * 8), "d4": convt_p(filt * 16, filt * 4),
        "d5": convt_p(filt * 8, filt * 2), "d6": convt_p(filt * 4, filt),
        "out": convt_p(filt * 2, 1),
    }


def pack_params(raw):
    """Convert PyTorch-layout weights to kernel-ready packed bf16 layouts."""
    packed = {}
    for name, p in raw.items():
        if name.startswith("att"):
            packed[name] = p
        elif name == "e1":
            packed[name] = {"w": pack_conv1_weight(p["w"]), "b": p["b"]}
        elif name.startswith("e"):
            packed[name] = {"w": pack_conv_weight(p["w"]), "b": p["b"]}
        else:  # d1..d6, out (ConvTranspose3d)
            packed[name] = {"w": pack_convt_weight_col(p["w"]), "b": p["b"]}
    return packed


def generator_forward(params, x_ncdhw):
    outs = []
    for n in range(x_ncdhw.shape[0]):
        x = jnp.transpose(x_ncdhw[n], (1, 2, 3, 0)).astype(jnp.float32)
        e1 = encode_block1(x, params["e1"])
        e2 = encode_block(e1, params["e2"])
        e3 = encode_block(e2, params["e3"])
        f1 = attention_block_dwn(e3, params["att1"])
        e4 = encode_block(f1, params["e4"])
        f2 = attention_block_dwn(e4, params["att2"])
        e5 = encode_block(f2, params["e5"])
        e6 = encode_block(e5, params["e6"])
        e7 = encode_block(e6, params["e7"], instance_norm=False)
        d1 = decode_block(e7, e6, params["d1"])
        d2 = decode_block(d1, e5, params["d2"])
        d3 = decode_block(d2, e4, params["d3"])
        d4 = decode_block(d3, e3, params["d4"])
        d5 = decode_block(d4, e2, params["d5"])
        d6 = decode_block(d5, e1, params["d6"])
        y = final_layer(d6, params["out"])
        outs.append(jnp.transpose(y, (3, 0, 1, 2)))      # back to (C, D, H, W)
    return jnp.stack(outs)


# ---------------------------------------------------------------------------
# Numerical self-check of the kernels against direct references
# ---------------------------------------------------------------------------
def _ref_conv3d(x, w):
    d, h, ww, ci = x.shape
    co = w.shape[0]
    do, ho, wo = d // 2, h // 2, ww // 2
    xp = np.zeros((d + 2, h + 2, ww + 2, ci), np.float32)
    xp[1:-1, 1:-1, 1:-1] = x
    y = np.zeros((do, ho, wo, co), np.float32)
    for kd in range(4):
        for kh in range(4):
            for kw in range(4):
                patch = xp[kd:kd + 2 * do:2, kh:kh + 2 * ho:2, kw:kw + 2 * wo:2]
                y += patch @ w[:, :, kd, kh, kw].T
    return y


def _ref_convt3d(x, w):
    d, h, ww, ci = x.shape
    co = w.shape[1]
    y = np.zeros((2 * d + 2, 2 * h + 2, 2 * ww + 2, co), np.float32)
    for kd in range(4):
        for kh in range(4):
            for kw in range(4):
                m = x @ w[:, :, kd, kh, kw]
                y[kd:kd + 2 * d:2, kh:kh + 2 * h:2, kw:kw + 2 * ww:2] += m
    return y[1:1 + 2 * d, 1:1 + 2 * h, 1:1 + 2 * ww]


def _self_check():
    rng = np.random.RandomState(0)
    rnd = lambda a: np.asarray(jnp.asarray(a).astype(jnp.bfloat16).astype(jnp.float32))
    tol = 2.5e-2

    # Conv, Mode A (weight-resident, multi-plane steps)
    x = rnd(rng.randn(4, 4, 4, 2).astype(np.float32))
    wa = rnd((0.1 * rng.randn(3, 2, 4, 4, 4)).astype(np.float32))
    got = np.asarray(conv3d_s2(jnp.asarray(x), pack_conv_weight(jnp.asarray(wa)),
                               jnp.zeros((3,), jnp.float32)).astype(jnp.float32))
    ref = _ref_conv3d(x, wa)
    assert np.max(np.abs(got - ref)) < tol, ("convA", float(np.max(np.abs(got - ref))))

    # Conv, Mode B (whole-volume resident, chunked weights, co split)
    wb = rnd((0.1 * rng.randn(256, 2, 4, 4, 4)).astype(np.float32))
    got = np.asarray(conv3d_s2(jnp.asarray(x), pack_conv_weight(jnp.asarray(wb)),
                               jnp.zeros((256,), jnp.float32), force_mode="B",
                               chunk_cap=4 * 16 * 128 * 2).astype(jnp.float32))
    ref = _ref_conv3d(x, wb)
    assert np.max(np.abs(got - ref)) < tol, ("convB", float(np.max(np.abs(got - ref))))

    # Encoder-1 im2col path (conv + bias + leaky relu)
    x1 = rnd(rng.randn(4, 4, 4, 1).astype(np.float32))
    w1 = rnd((0.1 * rng.randn(3, 1, 4, 4, 4)).astype(np.float32))
    b1 = rnd((0.1 * rng.randn(3)).astype(np.float32))
    got = np.asarray(encode_block1(jnp.asarray(x1),
                                   {"w": pack_conv1_weight(jnp.asarray(w1)),
                                    "b": jnp.asarray(b1)}).astype(jnp.float32))
    ref = _ref_conv3d(x1, w1) + b1
    ref = np.where(ref >= 0, ref, 0.2 * ref)
    assert np.max(np.abs(got - ref)) < tol, ("conv1", float(np.max(np.abs(got - ref))))

    # Transposed conv (col2im matmul + overlap-add fold)
    xt = rnd(rng.randn(2, 2, 2, 2).astype(np.float32))
    wt = rnd((0.1 * rng.randn(2, 3, 4, 4, 4)).astype(np.float32))
    got = np.asarray(convtranspose3d_s2(
        jnp.asarray(xt), pack_convt_weight_col(jnp.asarray(wt))).astype(jnp.float32))
    ref = _ref_convt3d(xt, wt)
    assert np.max(np.abs(got - ref)) < tol, ("convT", float(np.max(np.abs(got - ref))))


if __name__ == "__main__":
    _self_check()

    key = jax.random.PRNGKey(0)
    pkey, xkey = jax.random.split(key)
    params = pack_params(init_params(pkey))
    # Smallest spatial size consistent with the module's 7 stride-2 encoders.
    x = jax.random.normal(xkey, (1, 1, 128, 128, 128), dtype=jnp.float32)
    fwd = jax.jit(generator_forward)
    y = fwd(params, x)
    jax.block_until_ready(y)
    assert y.shape == (1, 1, 128, 128, 128), y.shape
    assert bool(jnp.all(jnp.isfinite(y)))
    print("KERNEL_OK")
</pallas_src>

<mosaic_0001>
module attributes {stable_mosaic.version = 11 : i64} {
  func.func @_convA_kernel(%arg0: i32, %arg1: memref<2x16x16xbf16, #tpu.memory_space<vmem>>, %arg2: memref<1x16x16xbf16, #tpu.memory_space<vmem>>, %arg3: memref<8x16x3xbf16, #tpu.memory_space<vmem>>, %arg4: memref<1x3xf32, #tpu.memory_space<vmem>>, %arg5: memref<2x6x3xbf16, #tpu.memory_space<vmem>>) attributes {dimension_semantics = [#tpu.dimension_semantics<parallel>], iteration_bounds = array<i64: 1>, scalar_prefetch = 0 : i64, scratch_operands = 0 : i64, tpu.core_type = #tpu.core_type<tc>, window_params = [{transform_indices = @transform_0, window_bounds = array<i64: 2, 16, 16>}, {transform_indices = @transform_1, window_bounds = array<i64: 1, 16, 16>}, {pipeline_mode = #tpu.pipeline_mode<synchronous>, transform_indices = @transform_2, window_bounds = array<i64: 8, 16, 3>}, {pipeline_mode = #tpu.pipeline_mode<synchronous>, transform_indices = @transform_3, window_bounds = array<i64: 1, 3>}, {transform_indices = @transform_4, window_bounds = array<i64: 2, 6, 3>}]} {
    %c0 = arith.constant 0 : index
    %c0_0 = arith.constant 0 : index
    %c0_1 = arith.constant 0 : index
    %0 = vector.load %arg1[%c0, %c0_0, %c0_1] : memref<2x16x16xbf16, #tpu.memory_space<vmem>>, vector<1x6x16xbf16>
    %1 = vector.shape_cast %0 : vector<1x6x16xbf16> to vector<6x16xbf16>
    %c0_2 = arith.constant 0 : index
    %c0_3 = arith.constant 0 : index
    %c0_4 = arith.constant 0 : index
    %2 = vector.load %arg3[%c0_2, %c0_3, %c0_4] : memref<8x16x3xbf16, #tpu.memory_space<vmem>>, vector<1x16x3xbf16>
    %3 = vector.shape_cast %2 : vector<1x16x3xbf16> to vector<16x3xbf16>
    %cst = arith.constant dense<0.000000e+00> : vector<6x3xf32>
    %4 = tpu.matmul %1, %3, %cst {dimension_numbers = #tpu.dot_dimension_numbers<[1], [0], [0], [1], [0, 0, 1, 1], [], []>} : vector<6x16xbf16>, vector<16x3xbf16>, vector<6x3xf32> -> vector<6x3xf32>
    %c1 = arith.constant 1 : index
    %c0_5 = arith.constant 0 : index
    %c0_6 = arith.constant 0 : index
    %5 = vector.load %arg1[%c1, %c0_5, %c0_6] : memref<2x16x16xbf16, #tpu.memory_space<vmem>>, vector<1x6x16xbf16>
    %6 = vector.shape_cast %5 : vector<1x6x16xbf16> to vector<6x16xbf16>
    %c1_7 = arith.constant 1 : index
    %c0_8 = arith.constant 0 : index
    %c0_9 = arith.constant 0 : index
    %7 = vector.load %arg3[%c1_7, %c0_8, %c0_9] : memref<8x16x3xbf16, #tpu.memory_space<vmem>>, vector<1x16x3xbf16>
    %8 = vector.shape_cast %7 : vector<1x16x3xbf16> to vector<16x3xbf16>
    %cst_10 = arith.constant dense<0.000000e+00> : vector<6x3xf32>
    %9 = tpu.matmul %6, %8, %cst_10 {dimension_numbers = #tpu.dot_dimension_numbers<[1], [0], [0], [1], [0, 0, 1, 1], [], []>} : vector<6x16xbf16>, vector<16x3xbf16>, vector<6x3xf32> -> vector<6x3xf32>
    %10 = arith.addf %4, %9 : vector<6x3xf32>
    %c0_11 = arith.constant 0 : index
    %c1_12 = arith.constant 1 : index
    %c0_13 = arith.constant 0 : index
    %11 = vector.load %arg1[%c0_11, %c1_12, %c0_13] : memref<2x16x16xbf16, #tpu.memory_space<vmem>>, vector<1x6x16xbf16>
    %12 = vector.shape_cast %11 : vector<1x6x16xbf16> to vector<6x16xbf16>
    %c2 = arith.constant 2 : index
    %c0_14 = arith.constant 0 : index
    %c0_15 = arith.constant 0 : index
    %13 = vector.load %arg3[%c2, %c0_14, %c0_15] : memref<8x16x3xbf16, #tpu.memory_space<vmem>>, vector<1x16x3xbf16>
    %14 = vector.shape_cast %13 : vector<1x16x3xbf16> to vector<16x3xbf16>
    %cst_16 = arith.constant dense<0.000000e+00> : vector<6x3xf32>
    %15 = tpu.matmul %12, %14, %cst_16 {dimension_numbers = #tpu.dot_dimension_numbers<[1], [0], [0], [1], [0, 0, 1, 1], [], []>} : vector<6x16xbf16>, vector<16x3xbf16>, vector<6x3xf32> -> vector<6x3xf32>
    %16 = arith.addf %10, %15 : vector<6x3xf32>
    %c1_17 = arith.constant 1 : index
    %c1_18 = arith.constant 1 : index
    %c0_19 = arith.constant 0 : index
    %17 = vector.load %arg1[%c1_17, %c1_18, %c0_19] : memref<2x16x16xbf16, #tpu.memory_space<vmem>>, vector<1x6x16xbf16>
    %18 = vector.shape_cast %17 : vector<1x6x16xbf16> to vector<6x16xbf16>
    %c3 = arith.constant 3 : index
    %c0_20 = arith.constant 0 : index
    %c0_21 = arith.constant 0 : index
    %19 = vector.load %arg3[%c3, %c0_20, %c0_21] : memref<8x16x3xbf16, #tpu.memory_space<vmem>>, vector<1x16x3xbf16>
    %20 = vector.shape_cast %19 : vector<1x16x3xbf16> to vector<16x3xbf16>
    %cst_22 = arith.constant dense<0.000000e+00> : vector<6x3xf32>
    %21 = tpu.matmul %18, %20, %cst_22 {dimension_numbers = #tpu.dot_dimension_numbers<[1], [0], [0], [1], [0, 0, 1, 1], [], []>} : vector<6x16xbf16>, vector<16x3xbf16>, vector<6x3xf32> -> vector<6x3xf32>
    %22 = arith.addf %16, %21 : vector<6x3xf32>
    %c0_23 = arith.constant 0 : index
    %c3_24 = arith.constant 3 : index
    %c0_25 = arith.constant 0 : index
    %23 = vector.load %arg1[%c0_23, %c3_24, %c0_25] : memref<2x16x16xbf16, #tpu.memory_space<vmem>>, vector<1x6x16xbf16>
    %24 = vector.shape_cast %23 : vector<1x6x16xbf16> to vector<6x16xbf16>
    %c4 = arith.constant 4 : index
    %c0_26 = arith.constant 0 : index
    %c0_27 = arith.constant 0 : index
    %25 = vector.load %arg3[%c4, %c0_26, %c0_27] : memref<8x16x3xbf16, #tpu.memory_space<vmem>>, vector<1x16x3xbf16>
    %26 = vector.shape_cast %25 : vector<1x16x3xbf16> to vector<16x3xbf16>
    %cst_28 = arith.constant dense<0.000000e+00> : vector<6x3xf32>
    %27 = tpu.matmul %24, %26, %cst_28 {dimension_numbers = #tpu.dot_dimension_numbers<[1], [0], [0], [1], [0, 0, 1, 1], [], []>} : vector<6x16xbf16>, vector<16x3xbf16>, vector<6x3xf32> -> vector<6x3xf32>
    %28 = arith.addf %22, %27 : vector<6x3xf32>
    %c1_29 = arith.constant 1 : index
    %c3_30 = arith.constant 3 : index
    %c0_31 = arith.constant 0 : index
    %29 = vector.load %arg1[%c1_29, %c3_30, %c0_31] : memref<2x16x16xbf16, #tpu.memory_space<vmem>>, vector<1x6x16xbf16>
    %30 = vector.shape_cast %29 : vector<1x6x16xbf16> to vector<6x16xbf16>
    %c5 = arith.constant 5 : index
    %c0_32 = arith.constant 0 : index
    %c0_33 = arith.constant 0 : index
    %31 = vector.load %arg3[%c5, %c0_32, %c0_33] : memref<8x16x3xbf16, #tpu.memory_space<vmem>>, vector<1x16x3xbf16>
    %32 = vector.shape_cast %31 : vector<1x16x3xbf16> to vector<16x3xbf16>
    %cst_34 = arith.constant dense<0.000000e+00> : vector<6x3xf32>
    %33 = tpu.matmul %30, %32, %cst_34 {dimension_numbers = #tpu.dot_dimension_numbers<[1], [0], [0], [1], [0, 0, 1, 1], [], []>} : vector<6x16xbf16>, vector<16x3xbf16>, vector<6x3xf32> -> vector<6x3xf32>
    %34 = arith.addf %28, %33 : vector<6x3xf32>
    %c0_35 = arith.constant 0 : index
    %c4_36 = arith.constant 4 : index
    %c0_37 = arith.constant 0 : index
    %35 = vector.load %arg1[%c0_35, %c4_36, %c0_37] : memref<2x16x16xbf16, #tpu.memory_space<vmem>>, vector<1x6x16xbf16>
    %36 = vector.shape_cast %35 : vector<1x6x16xbf16> to vector<6x16xbf16>
    %c6 = arith.constant 6 : index
    %c0_38 = arith.constant 0 : index
    %c0_39 = arith.constant 0 : index
    %37 = vector.load %arg3[%c6, %c0_38, %c0_39] : memref<8x16x3xbf16, #tpu.memory_space<vmem>>, vector<1x16x3xbf16>
    %38 = vector.shape_cast %37 : vector<1x16x3xbf16> to vector<16x3xbf16>
    %cst_40 = arith.constant dense<0.000000e+00> : vector<6x3xf32>
    %39 = tpu.matmul %36, %38, %cst_40 {dimension_numbers = #tpu.dot_dimension_numbers<[1], [0], [0], [1], [0, 0, 1, 1], [], []>} : vector<6x16xbf16>, vector<16x3xbf16>, vector<6x3xf32> -> vector<6x3xf32>
    %40 = arith.addf %34, %39 : vector<6x3xf32>
    %c1_41 = arith.constant 1 : index
    %c4_42 = arith.constant 4 : index
    %c0_43 = arith.constant 0 : index
    %41 = vector.load %arg1[%c1_41, %c4_42, %c0_43] : memref<2x16x16xbf16, #tpu.memory_space<vmem>>, vector<1x6x16xbf16>
    %42 = vector.shape_cast %41 : vector<1x6x16xbf16> to vector<6x16xbf16>
    %c7 = arith.constant 7 : index
    %c0_44 = arith.constant 0 : index
    %c0_45 = arith.constant 0 : index
    %43 = vector.load %arg3[%c7, %c0_44, %c0_45] : memref<8x16x3xbf16, #tpu.memory_space<vmem>>, vector<1x16x3xbf16>
    %44 = vector.shape_cast %43 : vector<1x16x3xbf16> to vector<16x3xbf16>
    %cst_46 = arith.constant dense<0.000000e+00> : vector<6x3xf32>
    %45 = tpu.matmul %42, %44, %cst_46 {dimension_numbers = #tpu.dot_dimension_numbers<[1], [0], [0], [1], [0, 0, 1, 1], [], []>} : vector<6x16xbf16>, vector<16x3xbf16>, vector<6x3xf32> -> vector<6x3xf32>
    %46 = arith.addf %40, %45 : vector<6x3xf32>
    %47 = arith.truncf %46 : vector<6x3xf32> to vector<6x3xbf16>
    %c0_47 = arith.constant 0 : index
    %c0_48 = arith.constant 0 : index
    %c0_49 = arith.constant 0 : index
    %48 = vector.load %arg5[%c0_47, %c0_48, %c0_49] : memref<2x6x3xbf16, #tpu.memory_space<vmem>>, vector<1x6x3xbf16>
    %49 = vector.shape_cast %48 : vector<1x6x3xbf16> to vector<6x3xbf16>
    %50 = vector.shape_cast %47 : vector<6x3xbf16> to vector<1x6x3xbf16>
    tpu.vector_store %arg5[%c0_47, %c0_48, %c0_49], %50 {strides = array<i32>} : memref<2x6x3xbf16, #tpu.memory_space<vmem>>, vector<1x6x3xbf16>,
    %c1_50 = arith.constant 1 : index
    %c0_51 = arith.constant 0 : index
    %c0_52 = arith.constant 0 : index
    %51 = vector.load %arg1[%c1_50, %c0_51, %c0_52] : memref<2x16x16xbf16, #tpu.memory_space<vmem>>, vector<1x6x16xbf16>
    %52 = vector.shape_cast %51 : vector<1x6x16xbf16> to vector<6x16xbf16>
    %c0_53 = arith.constant 0 : index
    %c0_54 = arith.constant 0 : index
    %c0_55 = arith.constant 0 : index
    %53 = vector.load %arg3[%c0_53, %c0_54, %c0_55] : memref<8x16x3xbf16, #tpu.memory_space<vmem>>, vector<1x16x3xbf16>
    %54 = vector.shape_cast %53 : vector<1x16x3xbf16> to vector<16x3xbf16>
    %cst_56 = arith.constant dense<0.000000e+00> : vector<6x3xf32>
    %55 = tpu.matmul %52, %54, %cst_56 {dimension_numbers = #tpu.dot_dimension_numbers<[1], [0], [0], [1], [0, 0, 1, 1], [], []>} : vector<6x16xbf16>, vector<16x3xbf16>, vector<6x3xf32> -> vector<6x3xf32>
    %c0_57 = arith.constant 0 : index
    %c0_58 = arith.constant 0 : index
    %c0_59 = arith.constant 0 : index
    %56 = vector.load %arg2[%c0_57, %c0_58, %c0_59] : memref<1x16x16xbf16, #tpu.memory_space<vmem>>, vector<1x6x16xbf16>
    %57 = vector.shape_cast %56 : vector<1x6x16xbf16> to vector<6x16xbf16>
    %c1_60 = arith.constant 1 : index
    %c0_61 = arith.constant 0 : index
    %c0_62 = arith.constant 0 : index
    %58 = vector.load %arg3[%c1_60, %c0_61, %c0_62] : memref<8x16x3xbf16, #tpu.memory_space<vmem>>, vector<1x16x3xbf16>
    %59 = vector.shape_cast %58 : vector<1x16x3xbf16> to vector<16x3xbf16>
    %cst_63 = arith.constant dense<0.000000e+00> : vector<6x3xf32>
    %60 = tpu.matmul %57, %59, %cst_63 {dimension_numbers = #tpu.dot_dimension_numbers<[1], [0], [0], [1], [0, 0, 1, 1], [], []>} : vector<6x16xbf16>, vector<16x3xbf16>, vector<6x3xf32> -> vector<6x3xf32>
    %61 = arith.addf %55, %60 : vector<6x3xf32>
    %c1_64 = arith.constant 1 : index
    %c1_65 = arith.constant 1 : index
    %c0_66 = arith.constant 0 : index
    %62 = vector.load %arg1[%c1_64, %c1_65, %c0_66] : memref<2x16x16xbf16, #tpu.memory_space<vmem>>, vector<1x6x16xbf16>
    %63 = vector.shape_cast %62 : vector<1x6x16xbf16> to vector<6x16xbf16>
    %c2_67 = arith.constant 2 : index
    %c0_68 = arith.constant 0 : index
    %c0_69 = arith.constant 0 : index
    %64 = vector.load %arg3[%c2_67, %c0_68, %c0_69] : memref<8x16x3xbf16, #tpu.memory_space<vmem>>, vector<1x16x3xbf16>
    %65 = vector.shape_cast %64 : vector<1x16x3xbf16> to vector<16x3xbf16>
    %cst_70 = arith.constant dense<0.000000e+00> : vector<6x3xf32>
    %66 = tpu.matmul %63, %65, %cst_70 {dimension_numbers = #tpu.dot_dimension_numbers<[1], [0], [0], [1], [0, 0, 1, 1], [], []>} : vector<6x16xbf16>, vector<16x3xbf16>, vector<6x3xf32> -> vector<6x3xf32>
    %67 = arith.addf %61, %66 : vector<6x3xf32>
    %c0_71 = arith.constant 0 : index
    %c1_72 = arith.constant 1 : index
    %c0_73 = arith.constant 0 : index
    %68 = vector.load %arg2[%c0_71, %c1_72, %c0_73] : memref<1x16x16xbf16, #tpu.memory_space<vmem>>, vector<1x6x16xbf16>
    %69 = vector.shape_cast %68 : vector<1x6x16xbf16> to vector<6x16xbf16>
    %c3_74 = arith.constant 3 : index
    %c0_75 = arith.constant 0 : index
    %c0_76 = arith.constant 0 : index
    %70 = vector.load %arg3[%c3_74, %c0_75, %c0_76] : memref<8x16x3xbf16, #tpu.memory_space<vmem>>, vector<1x16x3xbf16>
    %71 = vector.shape_cast %70 : vector<1x16x3xbf16> to vector<16x3xbf16>
    %cst_77 = arith.constant dense<0.000000e+00> : vector<6x3xf32>
    %72 = tpu.matmul %69, %71, %cst_77 {dimension_numbers = #tpu.dot_dimension_numbers<[1], [0], [0], [1], [0, 0, 1, 1], [], []>} : vector<6x16xbf16>, vector<16x3xbf16>, vector<6x3xf32> -> vector<6x3xf32>
    %73 = arith.addf %67, %72 : vector<6x3xf32>
    %c1_78 = arith.constant 1 : index
    %c3_79 = arith.constant 3 : index
    %c0_80 = arith.constant 0 : index
    %74 = vector.load %arg1[%c1_78, %c3_79, %c0_80] : memref<2x16x16xbf16, #tpu.memory_space<vmem>>, vector<1x6x16xbf16>
    %75 = vector.shape_cast %74 : vector<1x6x16xbf16> to vector<6x16xbf16>
    %c4_81 = arith.constant 4 : index
    %c0_82 = arith.constant 0 : index
    %c0_83 = arith.constant 0 : index
    %76 = vector.load %arg3[%c4_81, %c0_82, %c0_83] : memref<8x16x3xbf16, #tpu.memory_space<vmem>>, vector<1x16x3xbf16>
    %77 = vector.shape_cast %76 : vector<1x16x3xbf16> to vector<16x3xbf16>
    %cst_84 = arith.constant dense<0.000000e+00> : vector<6x3xf32>
    %78 = tpu.matmul %75, %77, %cst_84 {dimension_numbers = #tpu.dot_dimension_numbers<[1], [0], [0], [1], [0, 0, 1, 1], [], []>} : vector<6x16xbf16>, vector<16x3xbf16>, vector<6x3xf32> -> vector<6x3xf32>
    %79 = arith.addf %73, %78 : vector<6x3xf32>
    %c0_85 = arith.constant 0 : index
    %c3_86 = arith.constant 3 : index
    %c0_87 = arith.constant 0 : index
    %80 = vector.load %arg2[%c0_85, %c3_86, %c0_87] : memref<1x16x16xbf16, #tpu.memory_space<vmem>>, vector<1x6x16xbf16>
    %81 = vector.shape_cast %80 : vector<1x6x16xbf16> to vector<6x16xbf16>
    %c5_88 = arith.constant 5 : index
    %c0_89 = arith.constant 0 : index
    %c0_90 = arith.constant 0 : index
    %82 = vector.load %arg3[%c5_88, %c0_89, %c0_90] : memref<8x16x3xbf16, #tpu.memory_space<vmem>>, vector<1x16x3xbf16>
    %83 = vector.shape_cast %82 : vector<1x16x3xbf16> to vector<16x3xbf16>
    %cst_91 = arith.constant dense<0.000000e+00> : vector<6x3xf32>
    %84 = tpu.matmul %81, %83, %cst_91 {dimension_numbers = #tpu.dot_dimension_numbers<[1], [0], [0], [1], [0, 0, 1, 1], [], []>} : vector<6x16xbf16>, vector<16x3xbf16>, vector<6x3xf32> -> vector<6x3xf32>
    %85 = arith.addf %79, %84 : vector<6x3xf32>
    %c1_92 = arith.constant 1 : index
    %c4_93 = arith.constant 4 : index
    %c0_94 = arith.constant 0 : index
    %86 = vector.load %arg1[%c1_92, %c4_93, %c0_94] : memref<2x16x16xbf16, #tpu.memory_space<vmem>>, vector<1x6x16xbf16>
    %87 = vector.shape_cast %86 : vector<1x6x16xbf16> to vector<6x16xbf16>
    %c6_95 = arith.constant 6 : index
    %c0_96 = arith.constant 0 : index
    %c0_97 = arith.constant 0 : index
    %88 = vector.load %arg3[%c6_95, %c0_96, %c0_97] : memref<8x16x3xbf16, #tpu.memory_space<vmem>>, vector<1x16x3xbf16>
    %89 = vector.shape_cast %88 : vector<1x16x3xbf16> to vector<16x3xbf16>
    %cst_98 = arith.constant dense<0.000000e+00> : vector<6x3xf32>
    %90 = tpu.matmul %87, %89, %cst_98 {dimension_numbers = #tpu.dot_dimension_numbers<[1], [0], [0], [1], [0, 0, 1, 1], [], []>} : vector<6x16xbf16>, vector<16x3xbf16>, vector<6x3xf32> -> vector<6x3xf32>
    %91 = arith.addf %85, %90 : vector<6x3xf32>
    %c0_99 = arith.constant 0 : index
    %c4_100 = arith.constant 4 : index
    %c0_101 = arith.constant 0 : index
    %92 = vector.load %arg2[%c0_99, %c4_100, %c0_101] : memref<1x16x16xbf16, #tpu.memory_space<vmem>>, vector<1x6x16xbf16>
    %93 = vector.shape_cast %92 : vector<1x6x16xbf16> to vector<6x16xbf16>
    %c7_102 = arith.constant 7 : index
    %c0_103 = arith.constant 0 : index
    %c0_104 = arith.constant 0 : index
    %94 = vector.load %arg3[%c7_102, %c0_103, %c0_104] : memref<8x16x3xbf16, #tpu.memory_space<vmem>>, vector<1x16x3xbf16>
    %95 = vector.shape_cast %94 : vector<1x16x3xbf16> to vector<16x3xbf16>
    %cst_105 = arith.constant dense<0.000000e+00> : vector<6x3xf32>
    %96 = tpu.matmul %93, %95, %cst_105 {dimension_numbers = #tpu.dot_dimension_numbers<[1], [0], [0], [1], [0, 0, 1, 1], [], []>} : vector<6x16xbf16>, vector<16x3xbf16>, vector<6x3xf32> -> vector<6x3xf32>
    %97 = arith.addf %91, %96 : vector<6x3xf32>
    %98 = arith.truncf %97 : vector<6x3xf32> to vector<6x3xbf16>
    %c1_106 = arith.constant 1 : index
    %c0_107 = arith.constant 0 : index
    %c0_108 = arith.constant 0 : index
    %99 = vector.load %arg5[%c1_106, %c0_107, %c0_108] : memref<2x6x3xbf16, #tpu.memory_space<vmem>>, vector<1x6x3xbf16>
    %100 = vector.shape_cast %99 : vector<1x6x3xbf16> to vector<6x3xbf16>
    %101 = vector.shape_cast %98 : vector<6x3xbf16> to vector<1x6x3xbf16>
    tpu.vector_store %arg5[%c1_106, %c0_107, %c0_108], %101 {strides = array<i32>} : memref<2x6x3xbf16, #tpu.memory_space<vmem>>, vector<1x6x3xbf16>,
    return
  }
  func.func @transform_0(%arg0: i32) -> (i32, i32, i32) {
    %c0_i32 = arith.constant 0 : i32
    %c0_i32_0 = arith.constant 0 : i32
    %c0_i32_1 = arith.constant 0 : i32
    return %arg0, %c0_i32, %c0_i32_0 : i32, i32, i32
  }
  func.func @transform_1(%arg0: i32) -> (i32, i32, i32) {
    %c2_i32 = arith.constant 2 : i32
    %0 = arith.muli %arg0, %c2_i32 : i32
    %c2_i32_0 = arith.constant 2 : i32
    %1 = arith.addi %0, %c2_i32_0 : i32
    %c0_i32 = arith.constant 0 : i32
    %c0_i32_1 = arith.constant 0 : i32
    %c0_i32_2 = arith.constant 0 : i32
    return %1, %c0_i32, %c0_i32_1 : i32, i32, i32
  }
  func.func @transform_2(%arg0: i32) -> (i32, i32, i32) {
    %c0_i32 = arith.constant 0 : i32
    %c0_i32_0 = arith.constant 0 : i32
    %c0_i32_1 = arith.constant 0 : i32
    %c0_i32_2 = arith.constant 0 : i32
    return %c0_i32, %c0_i32_0, %c0_i32_1 : i32, i32, i32
  }
  func.func @transform_3(%arg0: i32) -> (i32, i32) {
    %c0_i32 = arith.constant 0 : i32
    %c0_i32_0 = arith.constant 0 : i32
    %c0_i32_1 = arith.constant 0 : i32
    return %c0_i32, %c0_i32_0 : i32, i32
  }
  func.func @transform_4(%arg0: i32) -> (i32, i32, i32) {
    %c0_i32 = arith.constant 0 : i32
    %c0_i32_0 = arith.constant 0 : i32
    %c0_i32_1 = arith.constant 0 : i32
    return %arg0, %c0_i32, %c0_i32_0 : i32, i32, i32
  }
}

</mosaic_0001>

<bundles_post_ra>
// kernel: tpu_custom_call.1
= control target key start
LH: loop header
LB: loop body
LE: loop exit
PB: predicated region body
PF: predicated region fallthrough
CT: control target
= control target key end

     0   :  { %v1326_v0 = vmov 0.0   ;;  %vm1327_vm0 = vmmov 0   ;;  %vm57_vm1 = vcmask 130048   ;;  %vm531_vm2 = vcmask 18432   ;;  %s1539_s3 = inlined_call_operand.vmem [shape: f32[1,3], index: 3, kind: input, shape index: {}]   ;;  %s1540_s2 = inlined_call_operand.vmem [shape: bf16[8,16,3], index: 2, kind: input, shape index: {}]   ;;  %s1541_s0 = inlined_call_operand.vmem [shape: bf16[3,16,16], index: 0, kind: input, shape index: {}]   ;;  %s1542_s1 = inlined_call_operand.vmem [shape: bf16[3,16,16], index: 1, kind: input, shape index: {}]   ;;  %s1543_s4 = inlined_call_operand.vmem [shape: bf16[2,6,3], index: 4, kind: output, shape index: {}]  }
   0x1   :  { %1144 = vmatprep.subr.bf16.mxu0 %v1326_v0  ;;  %1192 = vmatprep.subr.bf16.mxu1 %v1326_v0  ;;  %v1298_v1 = vld [vmem:[%s1540_s2 + $0x8] sm:$0xff]   ;;  %v1066_v4 = vld [vmem:[%s1542_s1 + $0x10] sm:$0x7]  ;;  %v1300_v5 = vld [vmem:[%s1540_s2] sm:$0xff]  }
   0x2   :  { %v1299_v2 = vld [vmem:[%s1540_s2 + $0x8] sm:$0xff]   ;;  %1146 = vmatprep.mubr.msk.bf16.mxu0 %vm1327_vm0, %v1326_v0  ;;  %1194 = vmatprep.mubr.msk.bf16.mxu1 %vm1327_vm0, %v1326_v0  ;;  %v1301_v6 = vld [vmem:[%s1540_s2] sm:$0xff]   ;;  %v1302_v10 = vld [vmem:[%s1540_s2 + $0x10] sm:$0xff]  }
   0x3   :  { %1145 = vmatpush3.bf16.msra.mxu0 %v1298_v1  ;;  %v1024_v3 = vld [vmem:[%s1541_s0 + $0x8] sm:$0x7]  ;;  %1193 = vmatpush3.bf16.msra.mxu1 %v1299_v2  ;;  %v43_v7 = vld [vmem:[%s1541_s0] sm:$0x7]  ;;  %v1303_v12 = vld [vmem:[%s1540_s2 + $0x10] sm:$0xff]  }
   0x4   :  { %1150 = vmatprep.subr.bf16.mxu0 %v1326_v0  ;;  %1198 = vmatprep.subr.bf16.mxu1 %v1326_v0  ;;  %v1304_v8 = vld [vmem:[%s1541_s0] ss:$0 sps:$4 sm:$0xff]   ;;  %v1305_v9 = vld [vmem:[%s1541_s0 + $0x8] ss:$0 sps:$4 sm:$0xff]   ;;  %v1306_v22 = vld [vmem:[%s1540_s2 + $0x18] sm:$0xff]  }
   0x5   :  { %v1065_v11 = vld [vmem:[%s1541_s0 + $0x8] sm:$0x7]  ;;  %v160_v13 = vshll.u32 %v1304_v8, 16  ;;  %v646_v14 = vshll.u32 %v1305_v9, 16  ;;  %v158_v15 = vshrl.u32 %v1304_v8, 16  ;;  %v644_v17 = vshrl.u32 %v1305_v9, 16 }
   0x6   :  { %1147 = vmatmul.mubr.msk.bf16.vlgmr.msra.gmra.mrb[0].mxu0 %vm57_vm1, %v1024_v3  ;;  %1195 = vmatmul.mubr.msk.bf16.vlgmr.msra.gmra.mrb[0].mxu1 %vm57_vm1, %v1066_v4  ;;  %v1308_v20 = vld [vmem:[%s1541_s0 + $0x8] ss:$0 sps:$4 sm:$0xff]   ;;  %v1309_v23 = vld [vmem:[%s1542_s1 + $0x10] ss:$0 sps:$4 sm:$0xff]   ;;  %v1307_v24 = vld [vmem:[%s1540_s2 + $0x18] sm:$0xff]  }
   0x7   :  { %1151 = vmatpush3.bf16.msra.mxu0 %v1300_v5  ;;  %1199 = vmatpush3.bf16.msra.mxu1 %v1301_v6  ;;  %v162_v16 = vrot.slane %v160_v13, 1  ;;  %v648_v18 = vrot.slane %v646_v14, 1  ;;  %v224_v25 = vshll.u32 %v1308_v20, 16  ;;  %v709_v26 = vshll.u32 %v1309_v23, 16  ;;  %v278_v31 = vld [vmem:[%s1541_s0] sm:$0xe] }
   0x8   :  { %1152 = vmatprep.mubr.msk.bf16.mxu0 %vm1327_vm0, %v1326_v0  ;;  %1200 = vmatprep.mubr.msk.bf16.mxu1 %vm1327_vm0, %v1326_v0  ;;  %v222_v27 = vshrl.u32 %v1308_v20, 16  ;;  %v707_v29 = vshrl.u32 %v1309_v23, 16  ;;  %v1439_v32 = vld [vmem:[%s1541_s0 + $0x4] sm:$0x1]  ;;  %v1085_v33 = vld [vmem:[%s1541_s0 + $0x8] sm:$0xe] }
   0x9   :  { %1156 = vmatprep.subr.bf16.mxu0 %v1326_v0  ;;  %1204 = vmatprep.subr.bf16.mxu1 %v1326_v0  ;;  %v163_v19 = vor.u32 %v162_v16, %v158_v15  ;;  %v649_v21 = vor.u32 %v648_v18, %v644_v17  ;;  %v226_v28 = vrot.slane %v224_v25, 1  ;;  %v711_v30 = vrot.slane %v709_v26, 1  ;;  %v1447_v34 = vld [vmem:[%s1541_s0 + $0xc] sm:$0x1]  ;;  %v1310_v38 = vld [vmem:[%s1540_s2 + $0x20] sm:$0xff]   ;;  %v1318_v6 = vld [vmem:[%s1540_s2 + $0x30] sm:$0xff]  }
   0xa   :  { %v1044_v36 = vcombine.low %v278_v31, %v1439_v32  ;;  %v1089_v39 = vcombine.low %v1085_v33, %v1447_v34  ;;  %v1311_v40 = vld [vmem:[%s1540_s2 + $0x20] sm:$0xff]   ;;  %v1047_v49 = vld [vmem:[%s1541_s0 + $0x8] sm:$0xe]  ;;  %v1048_v50 = vld [vmem:[%s1541_s0 + $0xc] sm:$0x1] }
   0xb   :  { %v227_v35 = vor.u32 %v226_v28, %v222_v27  ;;  %v712_v37 = vor.u32 %v711_v30, %v707_v29  ;;  %v1092_v51 = vld [vmem:[%s1542_s1 + $0x10] sm:$0xe]  ;;  %v1093_v52 = vld [vmem:[%s1542_s1 + $0x14] sm:$0x1]  ;;  %v1051_v54 = vcombine.low %v1047_v49, %v1048_v50  ;;  %v1314_v56 = vld [vmem:[%s1540_s2 + $0x28] sm:$0xff]  }
   0xc   :  { %v289_v41 = vshrl.u32 %v1044_v36, 16  ;;  %v292_v42 = vshll.u32 %v1044_v36, 16  ;;  %v773_v43 = vshrl.u32 %v1089_v39, 16  ;;  %v776_v44 = vshll.u32 %v1089_v39, 16  ;;  %v1315_v58 = vld [vmem:[%s1540_s2 + $0x28] sm:$0xff]   ;;  %v1322_v14 = vld [vmem:[%s1540_s2 + $0x38] sm:$0xff]  }
   0xd   :  { %v1096_v57 = vcombine.low %v1092_v51, %v1093_v52  ;;  %v357_v59 = vshrl.u32 %v1051_v54, 16  ;;  %v360_v60 = vshll.u32 %v1051_v54, 16  ;;  %v414_v8 = vld [vmem:[%s1541_s0] sm:$0xc]  ;;  %v1099_v9 = vld [vmem:[%s1541_s0 + $0x8] sm:$0xc] }
   0xe   :  { %v291_v45 = vrot.slane %v289_v41, 1  ;;  %v294_v46 = vrot.slane %v292_v42, 2  ;;  %v775_v47 = vrot.slane %v773_v43, 1  ;;  %v778_v48 = vrot.slane %v776_v44, 2  ;;  %v1323_v15 = vld [vmem:[%s1540_s2 + $0x38] sm:$0xff]  }
   0xf   :  { %v840_v61 = vshrl.u32 %v1096_v57, 16  ;;  %v843_v62 = vshll.u32 %v1096_v57, 16  ;;  %v359_v63 = vrot.slane %v357_v59, 1  ;;  %v362_v1 = vrot.slane %v360_v60, 2  ;;  %v1059_v16 = vld [vmem:[%s1541_s0 + $0x8] sm:$0xc] }
  0x10   :  { %v295_v53 = vor.u32 %v294_v46, %v291_v45  ;;  %v779_v55 = vor.u32 %v778_v48, %v775_v47  ;;  %v1105_v17 = vld [vmem:[%s1542_s1 + $0x10] sm:$0xc]  ;;  %v1062_v18 = vcombine.low %v1059_v16, %v1048_v50 }
  0x11   :  { %v842_v2 = vrot.slane %v840_v61, 1  ;;  %v845_v3 = vrot.slane %v843_v62, 2  ;;  %v363_v4 = vor.u32 %v362_v1, %v359_v63 }
  0x12   :  { %1153 = vmatmul.mubr.msk.bf16.vlgmr.msra.gmra.mrb[0].mxu0 %vm57_vm1, %v43_v7  ;;  %1201 = vmatmul.mubr.msk.bf16.vlgmr.msra.gmra.mrb[0].mxu1 %vm57_vm1, %v1065_v11  ;;  %v1319_v7 = vld [vmem:[%s1540_s2 + $0x30] sm:$0xff]   ;;  %v1102_v11 = vcombine.low %v1099_v9, %v1447_v34  ;;  %v479_v20 = vrot.slane %v1062_v18, 2 }
  0x13   :  { %1157 = vmatpush3.bf16.msra.mxu0 %v1302_v10  ;;  %1205 = vmatpush3.bf16.msra.mxu1 %v1303_v12  ;;  %v846_v5 = vor.u32 %v845_v3, %v842_v2  ;;  %v1056_v10 = vcombine.low %v414_v8, %v1439_v32 }
  0x14   :  { %1158 = vmatprep.mubr.msk.bf16.mxu0 %vm1327_vm0, %v1326_v0  ;;  %1206 = vmatprep.mubr.msk.bf16.mxu1 %vm1327_vm0, %v1326_v0  ;;  %v903_v13 = vrot.slane %v1102_v11, 2 }
  0x15   :  { %1162 = vmatprep.subr.bf16.mxu0 %v1326_v0  ;;  %1210 = vmatprep.subr.bf16.mxu1 %v1326_v0  ;;  %v421_v12 = vrot.slane %v1056_v10, 2 }
  0x1e   :  { %1159 = vmatmul.mubr.msk.bf16.vlgmr.msra.gmra.mrb[0].mxu0 %vm57_vm1, %v163_v19  ;;  %1207 = vmatmul.mubr.msk.bf16.vlgmr.msra.gmra.mrb[0].mxu1 %vm57_vm1, %v649_v21  ;;  %v1108_v19 = vcombine.low %v1105_v17, %v1093_v52 }
  0x1f   :  { %1163 = vmatpush3.bf16.msra.mxu0 %v1306_v22  ;;  %1211 = vmatpush3.bf16.msra.mxu1 %v1307_v24 }
  0x20   :  { %1164 = vmatprep.mubr.msk.bf16.mxu0 %vm1327_vm0, %v1326_v0  ;;  %1212 = vmatprep.mubr.msk.bf16.mxu1 %vm1327_vm0, %v1326_v0  ;;  %v960_v21 = vrot.slane %v1108_v19, 2 }
  0x21   :  { %1168 = vmatprep.subr.bf16.mxu0 %v1326_v0  ;;  %1216 = vmatprep.subr.bf16.mxu1 %v1326_v0 }
  0x2a   :  { %1165 = vmatmul.mubr.msk.bf16.vlgmr.msra.gmra.mrb[0].mxu0 %vm57_vm1, %v227_v35  ;;  %1213 = vmatmul.mubr.msk.bf16.vlgmr.msra.gmra.mrb[0].mxu1 %vm57_vm1, %v712_v37 }
  0x2b   :  { %1169 = vmatpush3.bf16.msra.mxu0 %v1310_v38  ;;  %1217 = vmatpush3.bf16.msra.mxu1 %v1311_v40 }
  0x2c   :  { %1170 = vmatprep.mubr.msk.bf16.mxu0 %vm1327_vm0, %v1326_v0  ;;  %1218 = vmatprep.mubr.msk.bf16.mxu1 %vm1327_vm0, %v1326_v0 }
  0x2d   :  { %1174 = vmatprep.subr.bf16.mxu0 %v1326_v0  ;;  %1222 = vmatprep.subr.bf16.mxu1 %v1326_v0 }
  0x36   :  { %1171 = vmatmul.mubr.msk.bf16.vlgmr.msra.gmra.mrb[0].mxu0 %vm57_vm1, %v295_v53  ;;  %1219 = vmatmul.mubr.msk.bf16.vlgmr.msra.gmra.mrb[0].mxu1 %vm57_vm1, %v779_v55 }
  0x37   :  { %1175 = vmatpush3.bf16.msra.mxu0 %v1314_v56  ;;  %1223 = vmatpush3.bf16.msra.mxu1 %v1315_v58 }
  0x38   :  { %1176 = vmatprep.mubr.msk.bf16.mxu0 %vm1327_vm0, %v1326_v0  ;;  %1224 = vmatprep.mubr.msk.bf16.mxu1 %vm1327_vm0, %v1326_v0 }
  0x39   :  { %1180 = vmatprep.subr.bf16.mxu0 %v1326_v0  ;;  %1228 = vmatprep.subr.bf16.mxu1 %v1326_v0 }
  0x42   :  { %1177 = vmatmul.mubr.msk.bf16.vlgmr.msra.gmra.mrb[0].mxu0 %vm57_vm1, %v363_v4  ;;  %1225 = vmatmul.mubr.msk.bf16.vlgmr.msra.gmra.mrb[0].mxu1 %vm57_vm1, %v846_v5 }
  0x43   :  { %1181 = vmatpush3.bf16.msra.mxu0 %v1318_v6  ;;  %1229 = vmatpush3.bf16.msra.mxu1 %v1319_v7 }
  0x44   :  { %1182 = vmatprep.mubr.msk.bf16.mxu0 %vm1327_vm0, %v1326_v0  ;;  %1230 = vmatprep.mubr.msk.bf16.mxu1 %vm1327_vm0, %v1326_v0 }
  0x45   :  { %1186 = vmatprep.subr.bf16.mxu0 %v1326_v0  ;;  %1234 = vmatprep.subr.bf16.mxu1 %v1326_v0 }
  0x4e   :  { %1183 = vmatmul.mubr.msk.bf16.vlgmr.msra.gmra.mrb[0].mxu0 %vm57_vm1, %v421_v12  ;;  %1231 = vmatmul.mubr.msk.bf16.vlgmr.msra.gmra.mrb[0].mxu1 %vm57_vm1, %v903_v13 }
  0x4f   :  { %1187 = vmatpush3.bf16.msra.mxu0 %v1322_v14  ;;  %1235 = vmatpush3.bf16.msra.mxu1 %v1323_v15 }
  0x50   :  { %1188 = vmatprep.mubr.msk.bf16.mxu0 %vm1327_vm0, %v1326_v0  ;;  %1236 = vmatprep.mubr.msk.bf16.mxu1 %vm1327_vm0, %v1326_v0 }
  0x5a   :  { %1189 = vmatmul.mubr.msk.bf16.vlgmr.msra.gmra.mrb[0].mxu0 %vm57_vm1, %v479_v20  ;;  %1237 = vmatmul.mubr.msk.bf16.vlgmr.msra.gmra.mrb[0].mxu1 %vm57_vm1, %v960_v21 }
 0x12d   :  { %v523_v22 = vpop.f32.mrb[0].mxu0  ;;  %v1004_v24 = vpop.f32.mrb[0].mxu1 }
 0x12e   :  { %v530_v23 = vpack.c.bf16 %v523_v22, %v523_v22  ;;  %v1190_v25 = vpop.f32.mrb[1].mxu0  ;;  %v1011_v26 = vpack.c.bf16 %v1004_v24, %v1004_v24  ;;  %v1238_v27 = vpop.f32.mrb[1].mxu1 }
 0x12f   :  { %v526_v28 = vpop.f32.mrb[2].mxu0  ;;  %v1007_v0 = vpop.f32.mrb[2].mxu1 }
 0x130   :  { %532 = vst.msk [vmem:[%s1543_s4] sm:$0x7] %vm531_vm2, %v530_v23  ;;  %v1191_v29 = vpop.f32.mrb[3].mxu0  ;;  %1111 = vst.msk [vmem:[%s1543_s4 + $0x4] sm:$0x7] %vm531_vm2, %v1011_v26  ;;  %v1239_v30 = vpop.f32.mrb[3].mxu1 }

</bundles_post_ra>
